<compile_context>
chip_gen: v7x
topology: tpu7x:2x2x1
jax: 0.10.0
libtpu: 0.0.40
codegen_flags: <defaults>
</compile_context>

<pallas_src>
import math
import jax
import jax.numpy as jnp
from jax.experimental import pallas as pl
from jax.experimental.pallas import tpu as pltpu


def _get_optimal_factors(n: int):
    factor = int(math.sqrt(n))
    while factor > 1 and n % factor != 0:
        factor -= 1
    return (n // factor, factor)


def _round_up(a: int, b: int) -> int:
    return (a + b - 1) // b * b


def _largest_divisor_multiple(n: int, unit: int, cap: int) -> int:
    """Largest d with d % unit == 0, n % d == 0 and d <= cap (falls back to unit)."""
    best = unit
    d = unit
    limit = min(n, max(cap, unit))
    while d <= limit:
        if n % d == 0:
            best = d
        d += unit
    return best


def _vmem_capacity_bytes() -> int:
    try:
        cap = getattr(pltpu.get_tpu_info(), "vmem_capacity_bytes", None)
        if cap:
            return int(cap)
    except Exception:
        pass
    return 64 << 20  # conservative (v7x-sized) fallback


def kron_linear_kernel(x_ref, wt_ref, bias_ref, out_ref, acc_ref):
    # x_ref   : (tn, tk)   lane-dense row tile of the input
    # wt_ref  : (tk, tf)   W^T block (column tile x K tile)
    # bias_ref: (1, tf)    f32 bias tile
    # out_ref : (tn, tf)
    # acc_ref : (tn, tf)   f32 VMEM accumulator across the K grid axis
    k = pl.program_id(2)

    @pl.when(k == 0)
    def _():
        acc_ref[...] = jnp.zeros_like(acc_ref)

    acc_ref[...] += jnp.dot(x_ref[...], wt_ref[...],
                            preferred_element_type=jnp.float32)

    @pl.when(k == pl.num_programs(2) - 1)
    def _():
        out_ref[...] = (acc_ref[...] + bias_ref[...].astype(jnp.float32)
                        ).astype(out_ref.dtype)


def kronecker_linear(x, kn_A, kn_B, bias, in_factors, out_factors, *, row_tile=None):
    """x: (..., in_features) -> (..., out_features)."""
    if1, if2 = in_factors
    of1, of2 = out_factors
    in_features = x.shape[-1]
    assert in_features == if1 * if2
    out_features = of1 * of2
    lead = x.shape[:-1]
    N = int(math.prod(lead)) if lead else 1

    x_item = jnp.dtype(x.dtype).itemsize
    out_item = x_item

    # W^T[j*if2 + i, k*of2 + o] = sum_s A[s, k, j] * B[s, o, i]
    # Cast to the activation dtype so bf16 activations use the bf16 MXU path.
    w_t = jnp.einsum('skj,soi->jiko', kn_A, kn_B).reshape(in_features, out_features)
    w_t = w_t.astype(x.dtype)
    w_item = jnp.dtype(w_t.dtype).itemsize
    bias2 = bias.reshape(1, out_features).astype(jnp.float32)

    # Lane-dense output: pad the feature axis of W^T / bias up to a multiple of
    # 128 (zeros) so stores are unmasked; only the tiny params are padded.
    of_pad = _round_up(out_features, 128)
    if of_pad != out_features:
        w_t = jnp.pad(w_t, ((0, 0), (0, of_pad - out_features)))
        bias2 = jnp.pad(bias2, ((0, 0), (0, of_pad - out_features)))

    vmem_cap = _vmem_capacity_bytes()

    # --- Tile selection (generation-aware) -------------------------------
    # K tile: keep full in_features unless it is large and 128-divisible.
    if in_features % 128 == 0:
        tk = _largest_divisor_multiple(in_features, 128,
                                       max(128, min(in_features, 4096)))
    else:
        tk = in_features  # full contraction dim (BlockSpec full-dim rule)

    # Row tile: double-buffered x tiles should use <= ~1/8 of VMEM.
    if row_tile is None:
        tn_cap = max(8, (vmem_cap // 8) // max(1, 2 * tk * x_item))
        row_tile = max(8, min(512, (tn_cap // 8) * 8))
    tn = max(8, min(_round_up(row_tile, 8), _round_up(N, 8)))

    # Column tile: W^T blocks (double-buffered) should use <= ~1/4 of VMEM.
    tf_cap = max(128, (vmem_cap // 4) // max(1, 2 * tk * w_item))
    tf = _largest_divisor_multiple(of_pad, 128, tf_cap)

    def _est(tn_, tf_):
        return (2 * tn_ * tk * x_item        # x (double-buffered)
                + 2 * tk * tf_ * w_item      # W^T block
                + 2 * tf_ * 4                # bias (f32)
                + 2 * tn_ * tf_ * out_item   # out tile
                + tn_ * tf_ * 4)             # f32 accumulator scratch

    budget = int(vmem_cap * 0.7)
    while _est(tn, tf) > budget and tf > 128:
        tf = _largest_divisor_multiple(of_pad, 128, tf - 128)
    while _est(tn, tf) > budget and tn > 64:
        tn = max(64, _round_up(tn // 2, 8))
    # TODO(synk): for extreme in_features*out_features, add a factored path
    # (apply B_s then A_s per sum term) instead of materializing W^T.

    x2 = x.reshape(N, in_features)
    n_row = pl.cdiv(N, tn)          # no wrapper-side padding of x
    n_col = of_pad // tf
    n_k = in_features // tk

    est = _est(tn, tf)
    vmem_limit = None
    if est > (12 << 20):            # v5e scoped default is only 16 MiB
        vmem_limit = int(min(max(2 * est, est + (8 << 20)),
                             int(vmem_cap * 0.75)))

    cost = pl.CostEstimate(
        flops=2 * N * in_features * of_pad,
        transcendentals=0,
        bytes_accessed=int(N * in_features * x_item
                           + in_features * of_pad * w_item
                           + N * of_pad * out_item),
    )

    # TODO(synk): on VMEM-tight chips with n_k == 1, pipeline_mode=pl.Buffered(1)
    # on the W^T / bias specs would recover one W^T-sized buffer.
    out = pl.pallas_call(
        kron_linear_kernel,
        out_shape=jax.ShapeDtypeStruct((N, of_pad), x.dtype),
        grid_spec=pltpu.PrefetchScalarGridSpec(
            num_scalar_prefetch=0,
            # Column axis OUTER (W^T block loaded once, reused over rows),
            # row axis middle (megacore shards rows -> x not duplicated),
            # K axis innermost (reduction with VMEM accumulator).
            grid=(n_col, n_row, n_k),
            in_specs=[
                pl.BlockSpec((tn, tk), lambda j, i, k: (i, k)),
                pl.BlockSpec((tk, tf), lambda j, i, k: (k, j)),
                pl.BlockSpec((1, tf), lambda j, i, k: (0, j)),
            ],
            out_specs=pl.BlockSpec((tn, tf), lambda j, i, k: (i, j)),
            scratch_shapes=[pltpu.VMEM((tn, tf), jnp.float32)],
        ),
        compiler_params=pltpu.CompilerParams(
            dimension_semantics=("arbitrary", "parallel", "arbitrary"),
            vmem_limit_bytes=vmem_limit,
        ),
        cost_estimate=cost,
    )(x2, w_t, bias2)

    if of_pad != out_features:
        out = out[:, :out_features]
    return out.reshape(*lead, out_features)


def _reference(x, kn_A, kn_B, bias):
    """Pure-JAX reference: explicit sum of Kronecker products."""
    num_sum, of1, if1 = kn_A.shape
    _, of2, if2 = kn_B.shape
    W = jnp.einsum('skj,soi->koji', kn_A, kn_B).reshape(of1 * of2, if1 * if2)
    return jnp.einsum('...n,mn->...m', x, W) + bias


if __name__ == "__main__":
    key = jax.random.PRNGKey(0)

    # Small, module-consistent shapes.
    Bsz, T = 2, 8
    in_features, out_features = 32, 32
    num_sum = 2

    if1, if2 = _get_optimal_factors(in_features)    # (8, 4)
    of1, of2 = _get_optimal_factors(out_features)   # (8, 4)

    k1, k2, k3, k4 = jax.random.split(key, 4)

    # Deterministic Kaiming-uniform-style init (a = sqrt(5) -> bound = 1/sqrt(fan_in)).
    bound_A = 1.0 / math.sqrt(of1 * if1)
    bound_B = 1.0 / math.sqrt(of2 * if2)
    kn_A = jax.random.uniform(k1, (num_sum, of1, if1), jnp.float32,
                              minval=-bound_A, maxval=bound_A)
    kn_B = jax.random.uniform(k2, (num_sum, of2, if2), jnp.float32,
                              minval=-bound_B, maxval=bound_B)
    bound_bias = 1.0 / math.sqrt(in_features)
    bias = jax.random.uniform(k3, (out_features,), jnp.float32,
                              minval=-bound_bias, maxval=bound_bias)

    x = jax.random.normal(k4, (Bsz, T, in_features), jnp.float32)

    y = kronecker_linear(x, kn_A, kn_B, bias, (if1, if2), (of1, of2))
    y = jax.block_until_ready(y)

    y_ref = _reference(x, kn_A, kn_B, bias)
    assert y.shape == (Bsz, T, out_features)
    assert jnp.allclose(y, y_ref, atol=1e-5, rtol=1e-5), \
        f"max abs diff {jnp.max(jnp.abs(y - y_ref))}"

    print("KERNEL_OK")
</pallas_src>

<mosaic_0001>
module attributes {stable_mosaic.version = 11 : i64} {
  func.func @kron_linear_kernel(%arg0: i32, %arg1: i32, %arg2: i32, %arg3: memref<16x32xf32, #tpu.memory_space<vmem>>, %arg4: memref<32x128xf32, #tpu.memory_space<vmem>>, %arg5: memref<1x128xf32, #tpu.memory_space<vmem>>, %arg6: memref<16x128xf32, #tpu.memory_space<vmem>>, %arg7: memref<16x128xf32, #tpu.memory_space<vmem>>) attributes {dimension_semantics = [#tpu.dimension_semantics<arbitrary>, #tpu.dimension_semantics<parallel>, #tpu.dimension_semantics<arbitrary>], iteration_bounds = array<i64: 1, 1, 1>, scalar_prefetch = 0 : i64, scratch_operands = 1 : i64, tpu.core_type = #tpu.core_type<tc>, window_params = [{transform_indices = @transform_0, window_bounds = array<i64: 16, 32>}, {transform_indices = @transform_1, window_bounds = array<i64: 32, 128>}, {transform_indices = @transform_2, window_bounds = array<i64: 1, 128>}, {transform_indices = @transform_3, window_bounds = array<i64: 16, 128>}]} {
    %c0_i32 = arith.constant 0 : i32
    %0 = arith.cmpi eq, %arg2, %c0_i32 : i32
    %1 = arith.extui %0 : i1 to i32
    %c0_i32_0 = arith.constant 0 : i32
    %2 = arith.cmpi ne, %1, %c0_i32_0 : i32
    scf.if %2 {
      %cst_10 = arith.constant 0.000000e+00 : f32
      %12 = vector.broadcast %cst_10 : f32 to vector<16x128xf32>
      %c0_11 = arith.constant 0 : index
      %c0_12 = arith.constant 0 : index
      %13 = vector.load %arg7[%c0_11, %c0_12] : memref<16x128xf32, #tpu.memory_space<vmem>>, vector<16x128xf32>
      tpu.vector_store %arg7[%c0_11, %c0_12], %12 {strides = array<i32>} : memref<16x128xf32, #tpu.memory_space<vmem>>, vector<16x128xf32>,
    } else {
    }
    %c0 = arith.constant 0 : index
    %c0_1 = arith.constant 0 : index
    %3 = vector.load %arg7[%c0, %c0_1] : memref<16x128xf32, #tpu.memory_space<vmem>>, vector<16x128xf32>
    %c0_2 = arith.constant 0 : index
    %c0_3 = arith.constant 0 : index
    %4 = vector.load %arg3[%c0_2, %c0_3] : memref<16x32xf32, #tpu.memory_space<vmem>>, vector<16x32xf32>
    %c0_4 = arith.constant 0 : index
    %c0_5 = arith.constant 0 : index
    %5 = vector.load %arg4[%c0_4, %c0_5] : memref<32x128xf32, #tpu.memory_space<vmem>>, vector<32x128xf32>
    %cst = arith.constant dense<0.000000e+00> : vector<16x128xf32>
    %6 = tpu.matmul %4, %5, %cst {dimension_numbers = #tpu.dot_dimension_numbers<[1], [0], [0], [1], [0, 0, 1, 1], [], []>} : vector<16x32xf32>, vector<32x128xf32>, vector<16x128xf32> -> vector<16x128xf32>
    %7 = arith.addf %3, %6 : vector<16x128xf32>
    %c0_6 = arith.constant 0 : index
    %c0_7 = arith.constant 0 : index
    %8 = vector.load %arg7[%c0_6, %c0_7] : memref<16x128xf32, #tpu.memory_space<vmem>>, vector<16x128xf32>
    tpu.vector_store %arg7[%c0_6, %c0_7], %7 {strides = array<i32>} : memref<16x128xf32, #tpu.memory_space<vmem>>, vector<16x128xf32>,
    %c0_i32_8 = arith.constant 0 : i32
    %9 = arith.cmpi eq, %arg2, %c0_i32_8 : i32
    %10 = arith.extui %9 : i1 to i32
    %c0_i32_9 = arith.constant 0 : i32
    %11 = arith.cmpi ne, %10, %c0_i32_9 : i32
    scf.if %11 {
      %c0_10 = arith.constant 0 : index
      %c0_11 = arith.constant 0 : index
      %12 = vector.load %arg7[%c0_10, %c0_11] : memref<16x128xf32, #tpu.memory_space<vmem>>, vector<16x128xf32>
      %c0_12 = arith.constant 0 : index
      %c0_13 = arith.constant 0 : index
      %13 = vector.load %arg5[%c0_12, %c0_13] : memref<1x128xf32, #tpu.memory_space<vmem>>, vector<1x128xf32>
      %14 = vector.broadcast %13 : vector<1x128xf32> to vector<16x128xf32>
      %15 = arith.addf %12, %14 : vector<16x128xf32>
      %c0_14 = arith.constant 0 : index
      %c0_15 = arith.constant 0 : index
      %16 = vector.load %arg6[%c0_14, %c0_15] : memref<16x128xf32, #tpu.memory_space<vmem>>, vector<16x128xf32>
      tpu.vector_store %arg6[%c0_14, %c0_15], %15 {strides = array<i32>} : memref<16x128xf32, #tpu.memory_space<vmem>>, vector<16x128xf32>,
    } else {
    }
    return
  }
  func.func @transform_0(%arg0: i32, %arg1: i32, %arg2: i32) -> (i32, i32) {
    %c0_i32 = arith.constant 0 : i32
    return %arg1, %arg2 : i32, i32
  }
  func.func @transform_1(%arg0: i32, %arg1: i32, %arg2: i32) -> (i32, i32) {
    %c0_i32 = arith.constant 0 : i32
    return %arg2, %arg0 : i32, i32
  }
  func.func @transform_2(%arg0: i32, %arg1: i32, %arg2: i32) -> (i32, i32) {
    %c0_i32 = arith.constant 0 : i32
    %c0_i32_0 = arith.constant 0 : i32
    return %c0_i32, %arg0 : i32, i32
  }
  func.func @transform_3(%arg0: i32, %arg1: i32, %arg2: i32) -> (i32, i32) {
    %c0_i32 = arith.constant 0 : i32
    return %arg1, %arg0 : i32, i32
  }
}

</mosaic_0001>

<bundles_post_ra>
// kernel: tpu_custom_call.1
= control target key start
LH: loop header
LB: loop body
LE: loop exit
PB: predicated region body
PF: predicated region fallthrough
CT: control target
= control target key end

     0   :  { %8 = vsyncpa [#allocation4], 0  ;;  %s355_s0 = inlined_call_operand.hbm [shape: f32[16,32], index: 0, kind: input, shape index: {}]   ;;  %s356_s1 = inlined_call_operand.hbm [shape: f32[32,128], index: 1, kind: input, shape index: {}]   ;;  %s357_s2 = inlined_call_operand.vmem [shape: f32[1,128], index: 2, kind: input, shape index: {}]   ;;  %s358_s3 = inlined_call_operand.hbm [shape: f32[16,128], index: 3, kind: output, shape index: {}]  }
   0x1   :  { %9 = vsyncpa [#allocation7], 0 }
   0x2   :  { %10 = vsyncpa [#allocation5], 0  ;;  %s282_s12 = smov [#allocation3]   ;;  %s210_s16 = scalar_lea.hbm %s355_s0, 256 }
   0x3   :  { %s16_s13 = sshll.u32 %s282_s12, 4  ;;  %p211_p0 = scmp.ne.s32.totalorder %s355_s0, %s210_s16  ;;  %s17_s13 = int_to_ptr.vmem [resolvable:$true] %s16_s13 }
   0x4   :  { %p214_p1 = scmp.lt.u32.totalorder %s210_s16, %s355_s0 }
   0x6   :  { %p216_p2 = pnand %p214_p1, %p211_p0 }
   0x8   :  { %219 = shalt.err (!%p216_p2)
}
   0x9   :  { %s220_s21 = scalar_lea.vmem %s17_s13, 256  ;;  %p225_p4 = scmp.lt.s32.totalorder %s17_s13, %s17_s13 }
   0xa   :  { %p221_p3 = scmp.ne.s32.totalorder %s17_s13, %s220_s21  ;;  %p226_p5 = scmp.lt.s32.totalorder %s220_s21, %s220_s21 }
   0xc   :  { %p227_p6 = por %p226_p5, %p225_p4 }
   0xe   :  { %p228_p7 = pnand %p227_p6, %p221_p3 }
  0x10   :  { %231 = shalt.err (!%p228_p7)
}
  0x11   :  { %s283_s22 = smov 128   ;;  %s284_s23 = smov 8  }
  0x12   :  { %22 = dma.hbm_to_vmem [thread:$0]  %s355_s0, 256, %s17_s13, [#allocation4], %s283_s22, %s283_s22, %s284_s23  }
  0x13   :  { %s285_s26 = smov [#allocation6]   ;;  %s232_s30 = scalar_lea.hbm %s356_s1, 512 }
  0x14   :  { %s28_s27 = sshll.u32 %s285_s26, 4  ;;  %p233_p8 = scmp.ne.s32.totalorder %s356_s1, %s232_s30  ;;  %s29_s27 = int_to_ptr.vmem [resolvable:$true] %s28_s27 }
  0x15   :  { %p236_p9 = scmp.lt.u32.totalorder %s232_s30, %s356_s1 }
  0x17   :  { %p238_p10 = pnand %p236_p9, %p233_p8 }
  0x19   :  { %241 = shalt.err (!%p238_p10)
}
  0x1a   :  { %s242_s8 = scalar_lea.vmem %s29_s27, 512  ;;  %p247_p12 = scmp.lt.s32.totalorder %s29_s27, %s29_s27 }
  0x1b   :  { %p243_p11 = scmp.ne.s32.totalorder %s29_s27, %s242_s8  ;;  %p248_p13 = scmp.lt.s32.totalorder %s242_s8, %s242_s8 }
  0x1d   :  { %p249_p0 = por %p248_p13, %p247_p12 }
  0x1f   :  { %p250_p1 = pnand %p249_p0, %p243_p11 }
  0x21   :  { %253 = shalt.err (!%p250_p1)
}
  0x22   :  { %34 = dma.hbm_to_vmem [thread:$0]  %s356_s1, 512, %s29_s27, [#allocation7], %s283_s22, %s283_s22, %s284_s23  }
  0x23   :  { %276 = dma.done.wait [#allocation4], 256  }
  0x24   :  { %277 = vsyncadd [#allocation4], 4294967040 }
  0x25   :  { %278 = dma.done.wait [#allocation7], 512  }
  0x26   :  { %279 = vsyncadd [#allocation7], 4294966784  ;;  %vm57_vm0 = vcmask 261120   ;;  %v53_v0 = vld [vmem:[#allocation6] sm:$0xff]  ;;  %v54_v1 = vld [vmem:[#allocation6 + $0x8] sm:$0xff]  ;;  %s286_s11 = smov [#allocation8]  }
  0x27   :  { %v55_v2 = vld [vmem:[#allocation6 + $0x10] sm:$0xff]  ;;  %v197_v3 = vpack.c.bf16 %v54_v1, %v53_v0  ;;  %v56_v4 = vld [vmem:[#allocation6 + $0x18] sm:$0xff]  ;;  %s164_s12 = sshll.u32 %s286_s11, 4  ;;  %s165_s12 = int_to_ptr.vmem [resolvable:$true] %s164_s12 }
  0x28   :  { %v51_v5 = vld [vmem:[#allocation3] sm:$0xff]  ;;  %v201_v6 = vpack.c.bf16 %v56_v4, %v55_v2  ;;  %v52_v7 = vld [vmem:[#allocation3 + $0x8] sm:$0xff]  ;;  %s254_s13 = scalar_lea.vmem %s165_s12, 256  ;;  %p259_p3 = scmp.lt.s32.totalorder %s165_s12, %s165_s12 }
  0x29   :  { %194 = vmatprep.mubr.msk.f32.mxu0 %vm57_vm0, %v51_v5  ;;  %198 = vmatprep.subr.bf16.mxu0 %v197_v3  ;;  %v179_v8 = vld [vmem:[%s357_s2] ss:$0 sm:$0xff]  ;;  %p255_p2 = scmp.ne.s32.totalorder %s165_s12, %s254_s13  ;;  %p260_p4 = scmp.lt.s32.totalorder %s254_s13, %s254_s13 }
  0x2a   :  { %200 = vmatpush3.bf16.msra.mxu0 %v197_v3 }
  0x2b   :  { %202 = vmatprep.subr.bf16.mxu0 %v201_v6  ;;  %p261_p5 = por %p260_p4, %p259_p3 }
  0x2d   :  { %p262_p6 = pnand %p261_p5, %p255_p2 }
  0x2e   :  { %204 = vmatpush3.bf16.msra.mxu0 %v201_v6 }
  0x31   :  { %195 = vmatmul.mubr.msk.f32.vlgmr.msra.gmra.mrb[0].mxu0 %vm57_vm0, %v52_v7 }
 0x104   :  { %v196_v9 = vpop.f32.mrb[0].mxu0 }
 0x105   :  { %v156_v10 = vadd.f32 %v196_v9, %v179_v8  ;;  %v130_v11 = vpop.f32.mrb[1].mxu0 }
 0x106   :  { %v155_v12 = vadd.f32 %v179_v8, %v130_v11 }
 0x107   :  { %158 = vst [vmem:[#allocation8 + $0x8] sm:$0xff] %v156_v10 }
 0x108   :  { %157 = vst [vmem:[#allocation8] sm:$0xff] %v155_v12 }
 0x109   :  { %265 = shalt.err (!%p262_p6)
}
 0x10a   :  { %s266_s2 = scalar_lea.hbm %s358_s3, 256 }
 0x10b   :  { %p267_p7 = scmp.ne.s32.totalorder %s358_s3, %s266_s2  ;;  %p270_p8 = scmp.lt.u32.totalorder %s266_s2, %s358_s3 }
 0x10d   :  { %p272_p9 = pnand %p270_p8, %p267_p7 }
 0x10f   :  { %275 = shalt.err (!%p272_p9)
}
 0x110   :  { %170 = dma.vmem_to_hbm [thread:$0]  %s165_s12, 256, %s358_s3, [#allocation5], %s283_s22, %s283_s22, %s284_s23  }
 0x111   :  { %280 = dma.done.wait [#allocation5], 256  }
 0x112   :  { %281 = vsyncadd [#allocation5], 4294967040 }
 0x113   :  { %174 = vsyncpa [#allocation4], 1 }
 0x114   :  { %175 = vsyncpa [#allocation7], 1 }
 0x115   :  { %176 = vsyncpa [#allocation5], 1 }

</bundles_post_ra>
